<compile_context>
chip_gen: v5e
topology: v5e:2x2
jax: 0.10.0
libtpu: 0.0.40
codegen_flags: <defaults>
</compile_context>

<pallas_src>
import jax
import jax.numpy as jnp
from jax.experimental import pallas as pl
from jax.experimental.pallas import tpu as pltpu


def _round_up(x, m):
    return ((x + m - 1) // m) * m


def _cdiv(a, m):
    return -(-a // m)


# --------------------------------------------------------------------------- #
# Kernel
# --------------------------------------------------------------------------- #
def videoclip_kernel(x_ref, wv_ref, bv_ref, wfc_ref, bfc_ref, pool_ref,
                     o_ref, acc_ref):
    # x_ref    : (TILE_M, TILE_K)        input dtype (f32/bf16) -- frame rows
    # wv_ref   : (TILE_K, n_emb_pad)     bf16  -- visual projection, K slice
    # bv_ref   : (1, n_emb_pad)          f32
    # wfc_ref  : (n_emb_pad, n_cls_pad)  bf16
    # bfc_ref  : (1, n_cls_pad)          f32
    # pool_ref : (TILE_B, TILE_M)        f32   -- block-diagonal 1/n_seg
    # o_ref    : (TILE_B, n_cls_pad)     f32   -- lane-dense logits tile
    # acc_ref  : (TILE_M, n_emb_pad)     f32   -- accumulator across the K axis
    k = pl.program_id(1)

    @pl.when(k == 0)
    def _():
        acc_ref[...] = jnp.zeros_like(acc_ref)

    # visual encoder: per-frame linear projection, K-tiled.  x is cast to bf16
    # in VMEM (avoids a separate HBM cast pass in the wrapper); f32 accumulate.
    acc_ref[...] += jnp.dot(x_ref[...].astype(jnp.bfloat16), wv_ref[...],
                            preferred_element_type=jnp.float32)

    @pl.when(k == pl.num_programs(1) - 1)
    def _():
        # fusion_model: temporal mean over n_seg frames, done as an MXU matmul
        # against the constant block-diagonal pooling matrix (keeps the
        # epilogue off the XLU / avoids a reshape copy).  Visual bias is
        # constant across frames -> added once after pooling (exact).
        pooled = jnp.dot(pool_ref[...], acc_ref[...],
                         preferred_element_type=jnp.float32) + bv_ref[...]
        # dropout: identity in eval mode.
        # fc head on the whole tile (M = TILE_B, lane-dense padded classes).
        logits = jnp.dot(pooled.astype(wfc_ref.dtype), wfc_ref[...],
                         preferred_element_type=jnp.float32) + bfc_ref[...]
        o_ref[...] = logits


# --------------------------------------------------------------------------- #
# Tiling
# --------------------------------------------------------------------------- #
def _vmem_info():
    cap = 64 << 20  # conservative default (v7x per-TC VMEM)
    try:
        info = pltpu.get_tpu_info()
        cap = int(getattr(info, "vmem_capacity_bytes", cap)) or cap
    except Exception:
        pass
    budget = int(cap * 0.72)   # ~46 MiB on v7x, ~92 MiB on v5e/v6e
    return cap, budget


def _select_tiles(b, n_seg, d_in, n_emb_pad, n_cls_pad, x_itemsize,
                  *, vmem_cap, budget):
    """Pick (tile_b, tile_k).  VMEM budget is spent on TILE_M (rows per step)
    first — it reduces w_visual re-streaming — then on TILE_K (capped at 2048,
    chosen to divide d_in so the activations need no feature-dim padding)."""
    two_core = vmem_cap <= (64 << 20)          # heuristic for v7x-class chips
    target_rows = 512 if two_core else 1024
    tile_k_cap = 2048

    def resident_bytes(tb):
        tm = tb * n_seg
        return (tm * n_emb_pad * 4              # f32 accumulator scratch
                + 2 * n_emb_pad * n_cls_pad * 2  # fc weight
                + 2 * tb * n_cls_pad * 4         # logits tile
                + 2 * tb * tm * 4                # pooling matrix
                + 2 * (n_emb_pad + n_cls_pad) * 4
                + (2 << 20))                     # headroom

    def per_k_col(tb):
        tm = tb * n_seg
        return 2 * (tm * x_itemsize + n_emb_pad * 2)  # dbl-buffered x + wv

    # --- rows per step: approach target_rows, shrink until >=128 K cols fit.
    tile_b = max(1, min(target_rows // max(n_seg, 1), b))
    while tile_b > 1 and budget - resident_bytes(tile_b) < per_k_col(tile_b) * 128:
        tile_b //= 2

    # --- 2-TC chips: prefer >=2 batch tiles so both TensorCores get work
    #     (only when the batch is big enough that padding waste stays bounded).
    if two_core and tile_b >= b >= 16:
        alt = _round_up(_cdiv(b, 2), 8)
        if _cdiv(b, alt) * alt - b <= b // 4:
            tile_b = alt

    if tile_b >= b:
        tile_b, nb = b, 1                       # single full-batch tile
    else:
        tile_b = max(8, (tile_b // 8) * 8)      # sublane-legal multi-tile block
        nb = _cdiv(b, tile_b)
        if two_core and nb > 1 and nb % 2 == 1:
            alt = _round_up(_cdiv(b, nb + 1), 8)
            nb_alt = _cdiv(b, alt)
            if nb_alt % 2 == 0 and nb_alt * alt - b <= b // 4:
                tile_b, nb = alt, nb_alt
        # trim the tile to minimize padded clips while keeping nb tiles
        tile_b = max(8, _round_up(_cdiv(b, nb), 8))
        nb = _cdiv(b, tile_b)
        if tile_b >= b:
            tile_b, nb = b, 1
    b_padded = nb * tile_b
    tile_m = tile_b * n_seg

    # --- K tile under the remaining VMEM budget; avoid padding x when possible.
    avail = budget - resident_bytes(tile_b)
    k_cols = max(128, min(avail // per_k_col(tile_b), tile_k_cap))
    k_cols = (k_cols // 128) * 128
    if d_in <= k_cols:
        tile_k, d_in_padded = d_in, d_in        # single K block (full-dim legal)
    elif d_in % 128 == 0:
        g, q = k_cols // 128, d_in // 128
        while q % g:                            # largest 128-multiple divisor
            g -= 1
        tile_k, d_in_padded = g * 128, d_in     # divides d_in -> no x padding
    else:
        tile_k = k_cols
        d_in_padded = _round_up(d_in, tile_k)   # fallback: pad x along d_in
    return tile_b, b_padded, tile_m, tile_k, d_in_padded


# --------------------------------------------------------------------------- #
# Wrapper
# --------------------------------------------------------------------------- #
def videoclip_forward(image_nchw, n_seg, w_visual, b_visual, w_fc, b_fc):
    """image_nchw: (bt, C, H, W), bt = b * n_seg.  Returns (b, n_cls) logits."""
    bt, C, H, W = image_nchw.shape
    assert bt % n_seg == 0
    b = bt // n_seg
    d_in = C * H * W
    n_emb = w_visual.shape[1]
    n_cls = w_fc.shape[1]
    x_itemsize = jnp.dtype(image_nchw.dtype).itemsize

    # Lane-dense padding of both the embedding and class dims (zero columns /
    # rows, exact; sliced back after the call).
    n_emb_pad = _round_up(n_emb, 128)
    n_cls_pad = _round_up(n_cls, 128)

    vmem_cap, budget = _vmem_info()
    tile_b, b_padded, tile_m, tile_k, d_in_padded = _select_tiles(
        b, n_seg, d_in, n_emb_pad, n_cls_pad, x_itemsize,
        vmem_cap=vmem_cap, budget=budget)

    # --- glue (plain XLA): layout + dtype prep -------------------------------
    # NCHW -> (bt, d_in): feature dim last -> 128-lane axis.  x keeps its input
    # dtype (bf16 cast happens per tile inside the kernel); weights are bf16.
    x = image_nchw.reshape(bt, d_in)
    wv = w_visual.astype(jnp.bfloat16)
    wfc = w_fc.astype(jnp.bfloat16)
    bv = b_visual.astype(jnp.float32)
    bfc = b_fc.astype(jnp.float32)

    if (d_in_padded != d_in) or (n_emb_pad != n_emb):
        wv = jnp.pad(wv, ((0, d_in_padded - d_in), (0, n_emb_pad - n_emb)))
    if (n_emb_pad != n_emb) or (n_cls_pad != n_cls):
        wfc = jnp.pad(wfc, ((0, n_emb_pad - n_emb), (0, n_cls_pad - n_cls)))
    if n_emb_pad != n_emb:
        bv = jnp.pad(bv, (0, n_emb_pad - n_emb))
    if n_cls_pad != n_cls:
        bfc = jnp.pad(bfc, (0, n_cls_pad - n_cls))
    pad_rows = (b_padded - b) * n_seg
    pad_cols = d_in_padded - d_in
    if pad_rows or pad_cols:
        x = jnp.pad(x, ((0, pad_rows), (0, pad_cols)))

    bv2 = bv.reshape(1, n_emb_pad)
    bfc2 = bfc.reshape(1, n_cls_pad)

    # Constant block-diagonal temporal mean-pooling matrix (tile_b, tile_m):
    # row c has 1/n_seg over the n_seg frame-rows of clip c.
    pool = jnp.repeat(jnp.eye(tile_b, dtype=jnp.float32), n_seg, axis=1) * (1.0 / n_seg)

    nb_tiles = b_padded // tile_b
    grid = (nb_tiles, d_in_padded // tile_k)

    cost = pl.CostEstimate(
        flops=(2 * b_padded * n_seg * d_in_padded * n_emb_pad
               + 2 * b_padded * tile_m * n_emb_pad
               + 2 * b_padded * n_emb_pad * n_cls_pad),
        transcendentals=0,
        bytes_accessed=int(x.size * x_itemsize
                           + wv.size * 2 * nb_tiles   # wv re-streamed per batch tile
                           + wfc.size * 2
                           + pool.size * 4
                           + b_padded * n_cls_pad * 4
                           + (n_emb_pad + n_cls_pad) * 4),
    )

    # Explicit VMEM limit: worst-case (all double-buffered) usage + headroom.
    vmem_bytes = (2 * tile_m * tile_k * x_itemsize
                  + 2 * tile_k * n_emb_pad * 2
                  + tile_m * n_emb_pad * 4
                  + 2 * n_emb_pad * n_cls_pad * 2
                  + 2 * tile_b * n_cls_pad * 4
                  + 2 * tile_b * tile_m * 4
                  + 4 * (n_emb_pad + n_cls_pad) * 4)
    vmem_limit = int(min(max(vmem_bytes + (6 << 20), 32 << 20), int(vmem_cap * 0.9)))

    def call(single_buffer_consts):
        const_mode = (dict(pipeline_mode=pl.Buffered(1))
                      if single_buffer_consts else {})
        in_specs = [
            pl.BlockSpec((tile_m, tile_k), lambda i, k: (i, k)),                # x
            pl.BlockSpec((tile_k, n_emb_pad), lambda i, k: (k, 0)),             # w_visual
            pl.BlockSpec((1, n_emb_pad), lambda i, k: (0, 0), **const_mode),    # b_visual
            pl.BlockSpec((n_emb_pad, n_cls_pad), lambda i, k: (0, 0), **const_mode),  # w_fc
            pl.BlockSpec((1, n_cls_pad), lambda i, k: (0, 0), **const_mode),    # b_fc
            pl.BlockSpec((tile_b, tile_m), lambda i, k: (0, 0), **const_mode),  # pooling mat
        ]
        return pl.pallas_call(
            videoclip_kernel,
            out_shape=jax.ShapeDtypeStruct((b_padded, n_cls_pad), jnp.float32),
            grid_spec=pltpu.PrefetchScalarGridSpec(
                num_scalar_prefetch=0,
                grid=grid,
                in_specs=in_specs,
                out_specs=pl.BlockSpec((tile_b, n_cls_pad), lambda i, k: (i, 0)),
                scratch_shapes=[pltpu.VMEM((tile_m, n_emb_pad), jnp.float32)],
            ),
            compiler_params=pltpu.CompilerParams(
                dimension_semantics=("parallel", "arbitrary"),
                vmem_limit_bytes=vmem_limit,
            ),
            cost_estimate=cost,
        )(x, wv, bv2, wfc, bfc2, pool)

    try:
        out = call(True)
    except Exception:
        # pipeline_mode=pl.Buffered(1) is only a VMEM saving on constant-index
        # operands; fall back to default double-buffering if unsupported.
        out = call(False)

    return out[:b, :n_cls]


# --------------------------------------------------------------------------- #
# Reference + demo
# --------------------------------------------------------------------------- #
def reference_forward(image_nchw, n_seg, w_visual, b_visual, w_fc, b_fc):
    bt = image_nchw.shape[0]
    b = bt // n_seg
    x = image_nchw.reshape(bt, -1)
    emb = x @ w_visual + b_visual                  # visual (per frame)
    emb = emb.reshape(b, n_seg, -1).mean(axis=1)   # fusion (mean over segments)
    return emb @ w_fc + b_fc                       # fc (dropout = identity in eval)


if __name__ == "__main__":
    # small shapes consistent with the module
    b, n_seg = 2, 8            # config.data.num_segments = 8
    C, H, W = 4, 16, 16
    n_emb = 32                 # config.network.n_emb
    n_cls = 16                 # config.data.num_classes
    bt = b * n_seg
    d_in = C * H * W

    key = jax.random.PRNGKey(0)
    k_img, k_wv, k_bv, k_wfc, k_bfc = jax.random.split(key, 5)

    image = jax.random.normal(k_img, (bt, C, H, W), dtype=jnp.float32)
    w_visual = jax.random.normal(k_wv, (d_in, n_emb), dtype=jnp.float32) * 0.02
    b_visual = jax.random.normal(k_bv, (n_emb,), dtype=jnp.float32) * 0.02
    w_fc = jax.random.normal(k_wfc, (n_emb, n_cls), dtype=jnp.float32) * 0.02
    b_fc = jax.random.normal(k_bfc, (n_cls,), dtype=jnp.float32) * 0.02

    logits = videoclip_forward(image, n_seg, w_visual, b_visual, w_fc, b_fc)
    logits = jax.block_until_ready(logits)

    ref = reference_forward(image, n_seg, w_visual, b_visual, w_fc, b_fc)
    assert logits.shape == (b, n_cls)
    # bf16 storage / f32 accumulation in the kernel vs a pure-f32 reference.
    assert jnp.allclose(logits, ref, atol=2e-2, rtol=2e-2), "mismatch vs reference"

    print("KERNEL_OK")
</pallas_src>

<mosaic_0001>
module attributes {stable_mosaic.version = 11 : i64} {
  func.func @videoclip_kernel(%arg0: i32, %arg1: i32, %arg2: memref<16x1024xf32, #tpu.memory_space<vmem>>, %arg3: memref<1024x128xbf16, #tpu.memory_space<vmem>>, %arg4: memref<1x128xf32, #tpu.memory_space<vmem>>, %arg5: memref<128x128xbf16, #tpu.memory_space<vmem>>, %arg6: memref<1x128xf32, #tpu.memory_space<vmem>>, %arg7: memref<2x16xf32, #tpu.memory_space<vmem>>, %arg8: memref<2x128xf32, #tpu.memory_space<vmem>>, %arg9: memref<16x128xf32, #tpu.memory_space<vmem>>) attributes {dimension_semantics = [#tpu.dimension_semantics<parallel>, #tpu.dimension_semantics<arbitrary>], iteration_bounds = array<i64: 1, 1>, scalar_prefetch = 0 : i64, scratch_operands = 1 : i64, tpu.core_type = #tpu.core_type<tc>, window_params = [{transform_indices = @transform_0, window_bounds = array<i64: 16, 1024>}, {transform_indices = @transform_1, window_bounds = array<i64: 1024, 128>}, {pipeline_mode = #tpu.pipeline_mode<synchronous>, transform_indices = @transform_2, window_bounds = array<i64: 1, 128>}, {pipeline_mode = #tpu.pipeline_mode<synchronous>, transform_indices = @transform_3, window_bounds = array<i64: 128, 128>}, {pipeline_mode = #tpu.pipeline_mode<synchronous>, transform_indices = @transform_4, window_bounds = array<i64: 1, 128>}, {pipeline_mode = #tpu.pipeline_mode<synchronous>, transform_indices = @transform_5, window_bounds = array<i64: 2, 16>}, {transform_indices = @transform_6, window_bounds = array<i64: 2, 128>}]} {
    %c0_i32 = arith.constant 0 : i32
    %0 = arith.cmpi eq, %arg1, %c0_i32 : i32
    %1 = arith.extui %0 : i1 to i32
    %c0_i32_0 = arith.constant 0 : i32
    %2 = arith.cmpi ne, %1, %c0_i32_0 : i32
    scf.if %2 {
      %cst_10 = arith.constant 0.000000e+00 : f32
      %13 = vector.broadcast %cst_10 : f32 to vector<16x128xf32>
      %c0_11 = arith.constant 0 : index
      %c0_12 = arith.constant 0 : index
      %14 = vector.load %arg9[%c0_11, %c0_12] : memref<16x128xf32, #tpu.memory_space<vmem>>, vector<16x128xf32>
      tpu.vector_store %arg9[%c0_11, %c0_12], %13 {strides = array<i32>} : memref<16x128xf32, #tpu.memory_space<vmem>>, vector<16x128xf32>,
    } else {
    }
    %c0 = arith.constant 0 : index
    %c0_1 = arith.constant 0 : index
    %3 = vector.load %arg9[%c0, %c0_1] : memref<16x128xf32, #tpu.memory_space<vmem>>, vector<16x128xf32>
    %c0_2 = arith.constant 0 : index
    %c0_3 = arith.constant 0 : index
    %4 = vector.load %arg2[%c0_2, %c0_3] : memref<16x1024xf32, #tpu.memory_space<vmem>>, vector<16x1024xf32>
    %5 = arith.truncf %4 : vector<16x1024xf32> to vector<16x1024xbf16>
    %c0_4 = arith.constant 0 : index
    %c0_5 = arith.constant 0 : index
    %6 = vector.load %arg3[%c0_4, %c0_5] : memref<1024x128xbf16, #tpu.memory_space<vmem>>, vector<1024x128xbf16>
    %cst = arith.constant dense<0.000000e+00> : vector<16x128xf32>
    %7 = tpu.matmul %5, %6, %cst {dimension_numbers = #tpu.dot_dimension_numbers<[1], [0], [0], [1], [0, 0, 1, 1], [], []>} : vector<16x1024xbf16>, vector<1024x128xbf16>, vector<16x128xf32> -> vector<16x128xf32>
    %8 = arith.addf %3, %7 : vector<16x128xf32>
    %c0_6 = arith.constant 0 : index
    %c0_7 = arith.constant 0 : index
    %9 = vector.load %arg9[%c0_6, %c0_7] : memref<16x128xf32, #tpu.memory_space<vmem>>, vector<16x128xf32>
    tpu.vector_store %arg9[%c0_6, %c0_7], %8 {strides = array<i32>} : memref<16x128xf32, #tpu.memory_space<vmem>>, vector<16x128xf32>,
    %c0_i32_8 = arith.constant 0 : i32
    %10 = arith.cmpi eq, %arg1, %c0_i32_8 : i32
    %11 = arith.extui %10 : i1 to i32
    %c0_i32_9 = arith.constant 0 : i32
    %12 = arith.cmpi ne, %11, %c0_i32_9 : i32
    scf.if %12 {
      %c0_10 = arith.constant 0 : index
      %c0_11 = arith.constant 0 : index
      %13 = vector.load %arg7[%c0_10, %c0_11] : memref<2x16xf32, #tpu.memory_space<vmem>>, vector<2x16xf32>
      %c0_12 = arith.constant 0 : index
      %c0_13 = arith.constant 0 : index
      %14 = vector.load %arg9[%c0_12, %c0_13] : memref<16x128xf32, #tpu.memory_space<vmem>>, vector<16x128xf32>
      %cst_14 = arith.constant dense<0.000000e+00> : vector<2x128xf32>
      %15 = tpu.matmul %13, %14, %cst_14 {dimension_numbers = #tpu.dot_dimension_numbers<[1], [0], [0], [1], [0, 0, 1, 1], [], []>} : vector<2x16xf32>, vector<16x128xf32>, vector<2x128xf32> -> vector<2x128xf32>
      %c0_15 = arith.constant 0 : index
      %c0_16 = arith.constant 0 : index
      %16 = vector.load %arg4[%c0_15, %c0_16] : memref<1x128xf32, #tpu.memory_space<vmem>>, vector<1x128xf32>
      %17 = vector.broadcast %16 : vector<1x128xf32> to vector<2x128xf32>
      %18 = arith.addf %15, %17 : vector<2x128xf32>
      %19 = arith.truncf %18 : vector<2x128xf32> to vector<2x128xbf16>
      %c0_17 = arith.constant 0 : index
      %c0_18 = arith.constant 0 : index
      %20 = vector.load %arg5[%c0_17, %c0_18] : memref<128x128xbf16, #tpu.memory_space<vmem>>, vector<128x128xbf16>
      %cst_19 = arith.constant dense<0.000000e+00> : vector<2x128xf32>
      %21 = tpu.matmul %19, %20, %cst_19 {dimension_numbers = #tpu.dot_dimension_numbers<[1], [0], [0], [1], [0, 0, 1, 1], [], []>} : vector<2x128xbf16>, vector<128x128xbf16>, vector<2x128xf32> -> vector<2x128xf32>
      %c0_20 = arith.constant 0 : index
      %c0_21 = arith.constant 0 : index
      %22 = vector.load %arg6[%c0_20, %c0_21] : memref<1x128xf32, #tpu.memory_space<vmem>>, vector<1x128xf32>
      %23 = vector.broadcast %22 : vector<1x128xf32> to vector<2x128xf32>
      %24 = arith.addf %21, %23 : vector<2x128xf32>
      %c0_22 = arith.constant 0 : index
      %c0_23 = arith.constant 0 : index
      %25 = vector.load %arg8[%c0_22, %c0_23] : memref<2x128xf32, #tpu.memory_space<vmem>>, vector<2x128xf32>
      tpu.vector_store %arg8[%c0_22, %c0_23], %24 {strides = array<i32>} : memref<2x128xf32, #tpu.memory_space<vmem>>, vector<2x128xf32>,
    } else {
    }
    return
  }
  func.func @transform_0(%arg0: i32, %arg1: i32) -> (i32, i32) {
    %c0_i32 = arith.constant 0 : i32
    return %arg0, %arg1 : i32, i32
  }
  func.func @transform_1(%arg0: i32, %arg1: i32) -> (i32, i32) {
    %c0_i32 = arith.constant 0 : i32
    %c0_i32_0 = arith.constant 0 : i32
    return %arg1, %c0_i32 : i32, i32
  }
  func.func @transform_2(%arg0: i32, %arg1: i32) -> (i32, i32) {
    %c0_i32 = arith.constant 0 : i32
    %c0_i32_0 = arith.constant 0 : i32
    %c0_i32_1 = arith.constant 0 : i32
    return %c0_i32, %c0_i32_0 : i32, i32
  }
  func.func @transform_3(%arg0: i32, %arg1: i32) -> (i32, i32) {
    %c0_i32 = arith.constant 0 : i32
    %c0_i32_0 = arith.constant 0 : i32
    %c0_i32_1 = arith.constant 0 : i32
    return %c0_i32, %c0_i32_0 : i32, i32
  }
  func.func @transform_4(%arg0: i32, %arg1: i32) -> (i32, i32) {
    %c0_i32 = arith.constant 0 : i32
    %c0_i32_0 = arith.constant 0 : i32
    %c0_i32_1 = arith.constant 0 : i32
    return %c0_i32, %c0_i32_0 : i32, i32
  }
  func.func @transform_5(%arg0: i32, %arg1: i32) -> (i32, i32) {
    %c0_i32 = arith.constant 0 : i32
    %c0_i32_0 = arith.constant 0 : i32
    %c0_i32_1 = arith.constant 0 : i32
    return %c0_i32, %c0_i32_0 : i32, i32
  }
  func.func @transform_6(%arg0: i32, %arg1: i32) -> (i32, i32) {
    %c0_i32 = arith.constant 0 : i32
    %c0_i32_0 = arith.constant 0 : i32
    return %arg0, %c0_i32 : i32, i32
  }
}

module attributes {stable_mosaic.version = 11 : i64} {
  func.func @videoclip_kernel(%arg0: i32, %arg1: i32, %arg2: memref<16x1024xf32, #tpu.memory_space<vmem>>, %arg3: memref<1024x128xbf16, #tpu.memory_space<vmem>>, %arg4: memref<1x128xf32, #tpu.memory_space<vmem>>, %arg5: memref<128x128xbf16, #tpu.memory_space<vmem>>, %arg6: memref<1x128xf32, #tpu.memory_space<vmem>>, %arg7: memref<2x16xf32, #tpu.memory_space<vmem>>, %arg8: memref<2x128xf32, #tpu.memory_space<vmem>>, %arg9: memref<16x128xf32, #tpu.memory_space<vmem>>) attributes {dimension_semantics = [#tpu.dimension_semantics<parallel>, #tpu.dimension_semantics<arbitrary>], iteration_bounds = array<i64: 1, 1>, scalar_prefetch = 0 : i64, scratch_operands = 1 : i64, tpu.core_type = #tpu.core_type<tc>, window_params = [{transform_indices = @transform_0, window_bounds = array<i64: 16, 1024>}, {transform_indices = @transform_1, window_bounds = array<i64: 1024, 128>}, {pipeline_mode = #tpu.pipeline_mode<synchronous>, transform_indices = @transform_2, window_bounds = array<i64: 1, 128>}, {pipeline_mode = #tpu.pipeline_mode<synchronous>, transform_indices = @transform_3, window_bounds = array<i64: 128, 128>}, {pipeline_mode = #tpu.pipeline_mode<synchronous>, transform_indices = @transform_4, window_bounds = array<i64: 1, 128>}, {pipeline_mode = #tpu.pipeline_mode<synchronous>, transform_indices = @transform_5, window_bounds = array<i64: 2, 16>}, {transform_indices = @transform_6, window_bounds = array<i64: 2, 128>}]} {
    %c0_i32 = arith.constant 0 : i32
    %0 = arith.cmpi eq, %arg1, %c0_i32 : i32
    %1 = arith.extui %0 : i1 to i32
    %c0_i32_0 = arith.constant 0 : i32
    %2 = arith.cmpi ne, %1, %c0_i32_0 : i32
    scf.if %2 {
      %cst_10 = arith.constant 0.000000e+00 : f32
      %13 = vector.broadcast %cst_10 : f32 to vector<16x128xf32>
      %c0_11 = arith.constant 0 : index
      %c0_12 = arith.constant 0 : index
      %14 = vector.load %arg9[%c0_11, %c0_12] : memref<16x128xf32, #tpu.memory_space<vmem>>, vector<16x128xf32>
      tpu.vector_store %arg9[%c0_11, %c0_12], %13 {strides = array<i32>} : memref<16x128xf32, #tpu.memory_space<vmem>>, vector<16x128xf32>,
    } else {
    }
    %c0 = arith.constant 0 : index
    %c0_1 = arith.constant 0 : index
    %3 = vector.load %arg9[%c0, %c0_1] : memref<16x128xf32, #tpu.memory_space<vmem>>, vector<16x128xf32>
    %c0_2 = arith.constant 0 : index
    %c0_3 = arith.constant 0 : index
    %4 = vector.load %arg2[%c0_2, %c0_3] : memref<16x1024xf32, #tpu.memory_space<vmem>>, vector<16x1024xf32>
    %5 = arith.truncf %4 : vector<16x1024xf32> to vector<16x1024xbf16>
    %c0_4 = arith.constant 0 : index
    %c0_5 = arith.constant 0 : index
    %6 = vector.load %arg3[%c0_4, %c0_5] : memref<1024x128xbf16, #tpu.memory_space<vmem>>, vector<1024x128xbf16>
    %cst = arith.constant dense<0.000000e+00> : vector<16x128xf32>
    %7 = tpu.matmul %5, %6, %cst {dimension_numbers = #tpu.dot_dimension_numbers<[1], [0], [0], [1], [0, 0, 1, 1], [], []>} : vector<16x1024xbf16>, vector<1024x128xbf16>, vector<16x128xf32> -> vector<16x128xf32>
    %8 = arith.addf %3, %7 : vector<16x128xf32>
    %c0_6 = arith.constant 0 : index
    %c0_7 = arith.constant 0 : index
    %9 = vector.load %arg9[%c0_6, %c0_7] : memref<16x128xf32, #tpu.memory_space<vmem>>, vector<16x128xf32>
    tpu.vector_store %arg9[%c0_6, %c0_7], %8 {strides = array<i32>} : memref<16x128xf32, #tpu.memory_space<vmem>>, vector<16x128xf32>,
    %c0_i32_8 = arith.constant 0 : i32
    %10 = arith.cmpi eq, %arg1, %c0_i32_8 : i32
    %11 = arith.extui %10 : i1 to i32
    %c0_i32_9 = arith.constant 0 : i32
    %12 = arith.cmpi ne, %11, %c0_i32_9 : i32
    scf.if %12 {
      %c0_10 = arith.constant 0 : index
      %c0_11 = arith.constant 0 : index
      %13 = vector.load %arg7[%c0_10, %c0_11] : memref<2x16xf32, #tpu.memory_space<vmem>>, vector<2x16xf32>
      %c0_12 = arith.constant 0 : index
      %c0_13 = arith.constant 0 : index
      %14 = vector.load %arg9[%c0_12, %c0_13] : memref<16x128xf32, #tpu.memory_space<vmem>>, vector<16x128xf32>
      %cst_14 = arith.constant dense<0.000000e+00> : vector<2x128xf32>
      %15 = tpu.matmul %13, %14, %cst_14 {dimension_numbers = #tpu.dot_dimension_numbers<[1], [0], [0], [1], [0, 0, 1, 1], [], []>} : vector<2x16xf32>, vector<16x128xf32>, vector<2x128xf32> -> vector<2x128xf32>
      %c0_15 = arith.constant 0 : index
      %c0_16 = arith.constant 0 : index
      %16 = vector.load %arg4[%c0_15, %c0_16] : memref<1x128xf32, #tpu.memory_space<vmem>>, vector<1x128xf32>
      %17 = vector.broadcast %16 : vector<1x128xf32> to vector<2x128xf32>
      %18 = arith.addf %15, %17 : vector<2x128xf32>
      %19 = arith.truncf %18 : vector<2x128xf32> to vector<2x128xbf16>
      %c0_17 = arith.constant 0 : index
      %c0_18 = arith.constant 0 : index
      %20 = vector.load %arg5[%c0_17, %c0_18] : memref<128x128xbf16, #tpu.memory_space<vmem>>, vector<128x128xbf16>
      %cst_19 = arith.constant dense<0.000000e+00> : vector<2x128xf32>
      %21 = tpu.matmul %19, %20, %cst_19 {dimension_numbers = #tpu.dot_dimension_numbers<[1], [0], [0], [1], [0, 0, 1, 1], [], []>} : vector<2x128xbf16>, vector<128x128xbf16>, vector<2x128xf32> -> vector<2x128xf32>
      %c0_20 = arith.constant 0 : index
      %c0_21 = arith.constant 0 : index
      %22 = vector.load %arg6[%c0_20, %c0_21] : memref<1x128xf32, #tpu.memory_space<vmem>>, vector<1x128xf32>
      %23 = vector.broadcast %22 : vector<1x128xf32> to vector<2x128xf32>
      %24 = arith.addf %21, %23 : vector<2x128xf32>
      %c0_22 = arith.constant 0 : index
      %c0_23 = arith.constant 0 : index
      %25 = vector.load %arg8[%c0_22, %c0_23] : memref<2x128xf32, #tpu.memory_space<vmem>>, vector<2x128xf32>
      tpu.vector_store %arg8[%c0_22, %c0_23], %24 {strides = array<i32>} : memref<2x128xf32, #tpu.memory_space<vmem>>, vector<2x128xf32>,
    } else {
    }
    return
  }
  func.func @transform_0(%arg0: i32, %arg1: i32) -> (i32, i32) {
    %c0_i32 = arith.constant 0 : i32
    return %arg0, %arg1 : i32, i32
  }
  func.func @transform_1(%arg0: i32, %arg1: i32) -> (i32, i32) {
    %c0_i32 = arith.constant 0 : i32
    %c0_i32_0 = arith.constant 0 : i32
    return %arg1, %c0_i32 : i32, i32
  }
  func.func @transform_2(%arg0: i32, %arg1: i32) -> (i32, i32) {
    %c0_i32 = arith.constant 0 : i32
    %c0_i32_0 = arith.constant 0 : i32
    %c0_i32_1 = arith.constant 0 : i32
    return %c0_i32, %c0_i32_0 : i32, i32
  }
  func.func @transform_3(%arg0: i32, %arg1: i32) -> (i32, i32) {
    %c0_i32 = arith.constant 0 : i32
    %c0_i32_0 = arith.constant 0 : i32
    %c0_i32_1 = arith.constant 0 : i32
    return %c0_i32, %c0_i32_0 : i32, i32
  }
  func.func @transform_4(%arg0: i32, %arg1: i32) -> (i32, i32) {
    %c0_i32 = arith.constant 0 : i32
    %c0_i32_0 = arith.constant 0 : i32
    %c0_i32_1 = arith.constant 0 : i32
    return %c0_i32, %c0_i32_0 : i32, i32
  }
  func.func @transform_5(%arg0: i32, %arg1: i32) -> (i32, i32) {
    %c0_i32 = arith.constant 0 : i32
    %c0_i32_0 = arith.constant 0 : i32
    %c0_i32_1 = arith.constant 0 : i32
    return %c0_i32, %c0_i32_0 : i32, i32
  }
  func.func @transform_6(%arg0: i32, %arg1: i32) -> (i32, i32) {
    %c0_i32 = arith.constant 0 : i32
    %c0_i32_0 = arith.constant 0 : i32
    return %arg0, %c0_i32 : i32, i32
  }
}

</mosaic_0001>

<bundles_post_ra>
// kernel: tpu_custom_call.1
= control target key start
LH: loop header
LB: loop body
LE: loop exit
PB: predicated region body
PF: predicated region fallthrough
CT: control target
= control target key end

     0   :  { %11 = vsyncpa [#allocation4], 0  ;;  %s1444_s0 = inlined_call_operand.hbm [shape: f32[16,1024], index: 0, kind: input, shape index: {}]   ;;  %s1445_s1 = inlined_call_operand.hbm [shape: bf16[1024,128], index: 1, kind: input, shape index: {}]   ;;  %s1446_s2 = inlined_call_operand.vmem [shape: f32[1,128], index: 2, kind: input, shape index: {}]   ;;  %s1447_s3 = inlined_call_operand.hbm [shape: bf16[128,128], index: 3, kind: input, shape index: {}]   ;;  %s1448_s4 = inlined_call_operand.hbm [shape: f32[1,128], index: 4, kind: input, shape index: {}]   ;;  %s1449_s5 = inlined_call_operand.vmem [shape: f32[2,16], index: 5, kind: input, shape index: {}]   ;;  %s1450_s6 = inlined_call_operand.hbm [shape: f32[2,128], index: 6, kind: output, shape index: {}]  }
   0x1   :  { %12 = vsyncpa [#allocation7], 0 }
   0x2   :  { %13 = vsyncpa [#allocation10], 0  ;;  %s32_s23 = sshll.u32 %s1445_s1, 4  ;;  %s33_s23 = int_to_ptr.hbm [resolvable:$true] %s32_s23 }
   0x3   :  { %14 = vsyncpa [#allocation5], 0  ;;  %s1380_s24 = smov [#allocation6]   ;;  %s19_s28 = sshll.u32 %s1444_s0, 4  ;;  %s20_s28 = int_to_ptr.hbm [resolvable:$true] %s19_s28 }
   0x4   :  { %s34_s25 = sshll.u32 %s1380_s24, 4  ;;  %s1381_s29 = smov 64   ;;  %s35_s25 = int_to_ptr.vmem [resolvable:$true] %s34_s25 }
   0x5   :  { %s1382_s30 = smov 4   ;;  %s1383_s7 = smov [#allocation3]  }
   0x6   :  { %40 = dma.hbm_to_vmem [thread:$0]  %s33_s23, 8192, %s35_s25, [#allocation7], %s1381_s29, %s1381_s29, %s1382_s30  }
   0x7   :  { %s21_s8 = sshll.u32 %s1383_s7, 4  ;;  %s47_s1 = sshll.u32 %s1447_s3, 4  ;;  %s22_s8 = int_to_ptr.vmem [resolvable:$true] %s21_s8  ;;  %s48_s1 = int_to_ptr.hbm [resolvable:$true] %s47_s1 }
   0x8   :  { %s1384_s11 = smov 1024   ;;  %s1385_s12 = smov [#allocation8]  }
   0x9   :  { %27 = dma.hbm_to_vmem [thread:$0]  %s20_s28, 2048, %s22_s8, [#allocation4], %s1384_s11, %s1384_s11, %s1381_s29  }
   0xa   :  { %s49_s13 = sshll.u32 %s1385_s12, 4  ;;  %s61_s0 = sshll.u32 %s1448_s4, 4  ;;  %s50_s13 = int_to_ptr.vmem [resolvable:$true] %s49_s13  ;;  %s62_s0 = int_to_ptr.hbm [resolvable:$true] %s61_s0 }
   0xb   :  { %55 = dma.hbm_to_vmem [thread:$0]  %s48_s1, 1024, %s50_s13, [#allocation7], %s1381_s29, %s1381_s29, %s1382_s30  }
   0xc   :  { %s1386_s16 = smov [#allocation9]  }
   0xd   :  { %s63_s17 = sshll.u32 %s1386_s16, 4  ;;  %s64_s17 = int_to_ptr.vmem [resolvable:$true] %s63_s17 }
   0xe   :  { %66 = dma.hbm_to_vmem [thread:$0]  %s62_s0, 16, %s64_s17, [#allocation10]  }
   0xf   :  { %1372 = dma.done.wait [#allocation4], 2048  }
  0x10   :  { %1373 = vsyncadd [#allocation4], 4294965248 }
  0x11   :  { %1374 = dma.done.wait [#allocation7], 9216  }
  0x12   :  { %1375 = vsyncadd [#allocation7], 4294958080 }
  0x13   :  { %1376 = dma.done.wait [#allocation10], 16  }
  0x14   :  { %1377 = vsyncadd [#allocation10], 4294967280  ;;  %v1177_v0 = vld [vmem:[#allocation6 + $0x38] sm:$0xff]  ;;  %v1176_v4 = vld [vmem:[#allocation6 + $0x30] sm:$0xff]  ;;  %vm755_vm0 = vcmask 130048   ;;  %s1387_s20 = smov [#allocation11]  }
  0x15   :  { %v1185_v1 = vld [vmem:[#allocation6 + $0x78] sm:$0xff]  ;;  %629 = vmatpush.bf16.msra.mxu0 %v1177_v0  ;;  %v1184_v5 = vld [vmem:[#allocation6 + $0x70] sm:$0xff]  ;;  %v1175_v8 = vld [vmem:[#allocation6 + $0x28] sm:$0xff]  ;;  %s867_s21 = sshll.u32 %s1387_s20, 4  ;;  %s868_s21 = int_to_ptr.vmem [resolvable:$true] %s867_s21 }
  0x16   :  { %v1193_v2 = vld [vmem:[#allocation6 + $0xb8] sm:$0xff]  ;;  %643 = vmatpush.bf16.msra.mxu1 %v1185_v1  ;;  %v1192_v6 = vld [vmem:[#allocation6 + $0xb0] sm:$0xff]  ;;  %v1183_v9 = vld [vmem:[#allocation6 + $0x68] sm:$0xff] }
  0x17   :  { %v1201_v3 = vld [vmem:[#allocation6 + $0xf8] sm:$0xff]  ;;  %657 = vmatpush.bf16.msra.mxu2 %v1193_v2  ;;  %v1200_v7 = vld [vmem:[#allocation6 + $0xf0] sm:$0xff]  ;;  %v1191_v10 = vld [vmem:[#allocation6 + $0xa8] sm:$0xff] }
  0x18   :  { %671 = vmatpush.bf16.msra.mxu3 %v1201_v3  ;;  %v1199_v11 = vld [vmem:[#allocation6 + $0xe8] sm:$0xff]  ;;  %v1174_v12 = vld [vmem:[#allocation6 + $0x20] sm:$0xff]  ;;  %v1173_v16 = vld [vmem:[#allocation6 + $0x18] sm:$0xff] }
  0x19   :  { %630 = vmatpush.bf16.msra.mxu0 %v1176_v4  ;;  %v1182_v13 = vld [vmem:[#allocation6 + $0x60] sm:$0xff]  ;;  %v1181_v17 = vld [vmem:[#allocation6 + $0x58] sm:$0xff]  ;;  %v1172_v20 = vld [vmem:[#allocation6 + $0x10] sm:$0xff] }
  0x1a   :  { %644 = vmatpush.bf16.msra.mxu1 %v1184_v5  ;;  %v1190_v14 = vld [vmem:[#allocation6 + $0xa0] sm:$0xff]  ;;  %v1189_v18 = vld [vmem:[#allocation6 + $0x98] sm:$0xff]  ;;  %v1180_v21 = vld [vmem:[#allocation6 + $0x50] sm:$0xff] }
  0x1b   :  { %658 = vmatpush.bf16.msra.mxu2 %v1192_v6  ;;  %v1198_v15 = vld [vmem:[#allocation6 + $0xe0] sm:$0xff]  ;;  %v1197_v19 = vld [vmem:[#allocation6 + $0xd8] sm:$0xff]  ;;  %v1188_v22 = vld [vmem:[#allocation6 + $0x90] sm:$0xff] }
  0x1c   :  { %672 = vmatpush.bf16.msra.mxu3 %v1200_v7  ;;  %v1196_v23 = vld [vmem:[#allocation6 + $0xd0] sm:$0xff]  ;;  %v1171_v24 = vld [vmem:[#allocation6 + $0x8] sm:$0xff]  ;;  %v1170_v28 = vld [vmem:[#allocation6] sm:$0xff] }
  0x1d   :  { %631 = vmatpush.bf16.msra.mxu0 %v1175_v8  ;;  %v1179_v25 = vld [vmem:[#allocation6 + $0x48] sm:$0xff]  ;;  %v1178_v29 = vld [vmem:[#allocation6 + $0x40] sm:$0xff]  ;;  %v1209_v32 = vld [vmem:[#allocation6 + $0x138] sm:$0xff] }
  0x1e   :  { %645 = vmatpush.bf16.msra.mxu1 %v1183_v9  ;;  %v1187_v26 = vld [vmem:[#allocation6 + $0x88] sm:$0xff]  ;;  %v1186_v30 = vld [vmem:[#allocation6 + $0x80] sm:$0xff]  ;;  %v1217_v33 = vld [vmem:[#allocation6 + $0x178] sm:$0xff] }
  0x1f   :  { %659 = vmatpush.bf16.msra.mxu2 %v1191_v10  ;;  %v1195_v27 = vld [vmem:[#allocation6 + $0xc8] sm:$0xff]  ;;  %v1194_v31 = vld [vmem:[#allocation6 + $0xc0] sm:$0xff]  ;;  %v95_v34 = vld [vmem:[#allocation3 + $0x10] sm:$0xff] }
  0x20   :  { %673 = vmatpush.bf16.msra.mxu3 %v1199_v11  ;;  %v103_v35 = vld [vmem:[#allocation3 + $0x50] sm:$0xff]  ;;  %v96_v36 = vld [vmem:[#allocation3 + $0x18] sm:$0xff]  ;;  %v93_v38 = vld [vmem:[#allocation3] sm:$0xff] }
  0x21   :  { %632 = vmatpush.bf16.msra.mxu0 %v1174_v12  ;;  %v104_v37 = vld [vmem:[#allocation3 + $0x58] sm:$0xff]  ;;  %v101_v39 = vld [vmem:[#allocation3 + $0x40] sm:$0xff]  ;;  %v94_v40 = vld [vmem:[#allocation3 + $0x8] sm:$0xff]  ;;  %v111_v44 = vpack.c.bf16 %v103_v35, %v95_v34 }
  0x22   :  { %646 = vmatpush.bf16.msra.mxu1 %v1182_v13  ;;  %v102_v41 = vld [vmem:[#allocation3 + $0x48] sm:$0xff]  ;;  %v1225_v42 = vld [vmem:[#allocation6 + $0x1b8] sm:$0xff]  ;;  %v112_v45 = vpack.c.bf16 %v104_v37, %v96_v36  ;;  %v109_v46 = vpack.c.bf16 %v101_v39, %v93_v38  ;;  %v1208_v48 = vld [vmem:[#allocation6 + $0x130] sm:$0xff] }
  0x23   :  { %660 = vmatpush.bf16.msra.mxu2 %v1190_v14  ;;  %v1233_v43 = vld [vmem:[#allocation6 + $0x1f8] sm:$0xff]  ;;  %v110_v47 = vpack.c.bf16 %v102_v41, %v94_v40  ;;  %v1216_v49 = vld [vmem:[#allocation6 + $0x170] sm:$0xff]  ;;  %v1207_v52 = vld [vmem:[#allocation6 + $0x128] sm:$0xff] }
  0x24   :  { %674 = vmatpush.bf16.msra.mxu3 %v1198_v15  ;;  %v1224_v50 = vld [vmem:[#allocation6 + $0x1b0] sm:$0xff]  ;;  %v1215_v53 = vld [vmem:[#allocation6 + $0x168] sm:$0xff]  ;;  %v1206_v56 = vld [vmem:[#allocation6 + $0x120] sm:$0xff] }
  0x25   :  { %633 = vmatpush.bf16.msra.mxu0 %v1173_v16  ;;  %v1232_v51 = vld [vmem:[#allocation6 + $0x1f0] sm:$0xff]  ;;  %v1223_v54 = vld [vmem:[#allocation6 + $0x1a8] sm:$0xff]  ;;  %v1214_v57 = vld [vmem:[#allocation6 + $0x160] sm:$0xff] }
  0x26   :  { %647 = vmatpush.bf16.msra.mxu1 %v1181_v17  ;;  %v1231_v55 = vld [vmem:[#allocation6 + $0x1e8] sm:$0xff]  ;;  %v1222_v58 = vld [vmem:[#allocation6 + $0x1a0] sm:$0xff]  ;;  %v1205_v60 = vld [vmem:[#allocation6 + $0x118] sm:$0xff] }
  0x27   :  { %661 = vmatpush.bf16.msra.mxu2 %v1189_v18  ;;  %v1230_v59 = vld [vmem:[#allocation6 + $0x1e0] sm:$0xff]  ;;  %v1213_v61 = vld [vmem:[#allocation6 + $0x158] sm:$0xff]  ;;  %v1204_v0 = vld [vmem:[#allocation6 + $0x110] sm:$0xff] }
  0x28   :  { %675 = vmatpush.bf16.msra.mxu3 %v1197_v19  ;;  %v1221_v62 = vld [vmem:[#allocation6 + $0x198] sm:$0xff]  ;;  %v1212_v1 = vld [vmem:[#allocation6 + $0x150] sm:$0xff]  ;;  %v1203_v4 = vld [vmem:[#allocation6 + $0x108] sm:$0xff] }
  0x29   :  { %634 = vmatpush.bf16.msra.mxu0 %v1172_v20  ;;  %v1229_v63 = vld [vmem:[#allocation6 + $0x1d8] sm:$0xff]  ;;  %v1220_v2 = vld [vmem:[#allocation6 + $0x190] sm:$0xff]  ;;  %v1211_v5 = vld [vmem:[#allocation6 + $0x148] sm:$0xff] }
  0x2a   :  { %648 = vmatpush.bf16.msra.mxu1 %v1180_v21  ;;  %v1228_v3 = vld [vmem:[#allocation6 + $0x1d0] sm:$0xff]  ;;  %v1219_v6 = vld [vmem:[#allocation6 + $0x188] sm:$0xff]  ;;  %v1202_v8 = vld [vmem:[#allocation6 + $0x100] sm:$0xff] }
  0x2b   :  { %662 = vmatpush.bf16.msra.mxu2 %v1188_v22  ;;  %v1227_v7 = vld [vmem:[#allocation6 + $0x1c8] sm:$0xff]  ;;  %v1210_v9 = vld [vmem:[#allocation6 + $0x140] sm:$0xff]  ;;  %v99_v16 = vld [vmem:[#allocation3 + $0x30] sm:$0xff] }
  0x2c   :  { %676 = vmatpush.bf16.msra.mxu3 %v1196_v23  ;;  %v1218_v10 = vld [vmem:[#allocation6 + $0x180] sm:$0xff]  ;;  %v98_v14 = vld [vmem:[#allocation3 + $0x28] sm:$0xff]  ;;  %v107_v17 = vld [vmem:[#allocation3 + $0x70] sm:$0xff] }
  0x2d   :  { %635 = vmatpush.bf16.msra.mxu0 %v1171_v24  ;;  %v1226_v11 = vld [vmem:[#allocation6 + $0x1c0] sm:$0xff]  ;;  %v106_v15 = vld [vmem:[#allocation3 + $0x68] sm:$0xff]  ;;  %v100_v18 = vld [vmem:[#allocation3 + $0x38] sm:$0xff]  ;;  %v115_v22 = vpack.c.bf16 %v107_v17, %v99_v16 }
  0x2e   :  { %649 = vmatpush.bf16.msra.mxu1 %v1179_v25  ;;  %v97_v12 = vld [vmem:[#allocation3 + $0x20] sm:$0xff]  ;;  %v108_v19 = vld [vmem:[#allocation3 + $0x78] sm:$0xff]  ;;  %v114_v21 = vpack.c.bf16 %v106_v15, %v98_v14 }
  0x2f   :  { %663 = vmatpush.bf16.msra.mxu2 %v1187_v26  ;;  %v105_v13 = vld [vmem:[#allocation3 + $0x60] sm:$0xff]  ;;  %v116_v23 = vpack.c.bf16 %v108_v19, %v100_v18 }
  0x30   :  { %677 = vmatpush.bf16.msra.mxu3 %v1195_v27  ;;  %v113_v20 = vpack.c.bf16 %v105_v13, %v97_v12  ;;  %v1238_v38 = vld [vmem:[#allocation8 + $0x20] sm:$0xff] }
  0x31   :  { %636 = vmatpush.bf16.msra.mxu0 %v1170_v28  ;;  %v1241_v28 = vld [vmem:[#allocation8 + $0x38] sm:$0xff] }
  0x32   :  { %650 = vmatpush.bf16.msra.mxu1 %v1178_v29 }
  0x33   :  { %664 = vmatpush.bf16.msra.mxu2 %v1186_v30  ;;  %v1240_v30 = vld [vmem:[#allocation8 + $0x30] sm:$0xff] }
  0x34   :  { %678 = vmatpush.bf16.msra.mxu3 %v1194_v31  ;;  %637 = vmatmul.bf16.vlgmr.msra.gmra.mxu0 %v109_v46 }
  0x35   :  { %685 = vmatpush.bf16.msrb.mxu0 %v1209_v32  ;;  %651 = vmatmul.bf16.vlgmr.msra.gmra.mxu1 %v110_v47  ;;  %v1239_v32 = vld [vmem:[#allocation8 + $0x28] sm:$0xff] }
  0x36   :  { %699 = vmatpush.bf16.msrb.mxu1 %v1217_v33  ;;  %665 = vmatmul.bf16.vlgmr.msra.gmra.mxu2 %v111_v44 }
  0x37   :  { %713 = vmatpush.bf16.msrb.mxu2 %v1225_v42  ;;  %679 = vmatmul.bf16.vlgmr.msra.gmra.mxu3 %v112_v45  ;;  %v1237_v42 = vld [vmem:[#allocation8 + $0x18] sm:$0xff] }
  0x38   :  { %727 = vmatpush.bf16.msrb.mxu3 %v1233_v43 }
  0x39   :  { %686 = vmatpush.bf16.msrb.mxu0 %v1208_v48  ;;  %v1236_v48 = vld [vmem:[#allocation8 + $0x10] sm:$0xff] }
  0x3a   :  { %700 = vmatpush.bf16.msrb.mxu1 %v1216_v49 }
  0x3b   :  { %714 = vmatpush.bf16.msrb.mxu2 %v1224_v50 }
  0x3c   :  { %728 = vmatpush.bf16.msrb.mxu3 %v1232_v51 }
  0x3d   :  { %687 = vmatpush.bf16.msrb.mxu0 %v1207_v52  ;;  %v1235_v52 = vld [vmem:[#allocation8 + $0x8] sm:$0xff] }
  0x3e   :  { %701 = vmatpush.bf16.msrb.mxu1 %v1215_v53 }
  0x3f   :  { %715 = vmatpush.bf16.msrb.mxu2 %v1223_v54 }
  0x40   :  { %729 = vmatpush.bf16.msrb.mxu3 %v1231_v55 }
  0x41   :  { %688 = vmatpush.bf16.msrb.mxu0 %v1206_v56 }
  0x42   :  { %702 = vmatpush.bf16.msrb.mxu1 %v1214_v57 }
  0x43   :  { %716 = vmatpush.bf16.msrb.mxu2 %v1222_v58 }
  0x44   :  { %730 = vmatpush.bf16.msrb.mxu3 %v1230_v59 }
  0x45   :  { %689 = vmatpush.bf16.msrb.mxu0 %v1205_v60 }
  0x46   :  { %703 = vmatpush.bf16.msrb.mxu1 %v1213_v61  ;;  %v748_v61 = vld [vmem:[%s1449_s5] sm:$0x3]  ;;  %s869_s5 = sshll.u32 %s1450_s6, 4  ;;  %s870_s5 = int_to_ptr.hbm [resolvable:$true] %s869_s5 }
  0x47   :  { %717 = vmatpush.bf16.msrb.mxu2 %v1221_v62  ;;  %v1234_v62 = vld [vmem:[#allocation8] sm:$0xff] }
  0x48   :  { %731 = vmatpush.bf16.msrb.mxu3 %v1229_v63  ;;  %v1250_v63 = vld [vmem:[%s1446_s2] ss:$0 sm:$0xff] }
  0x49   :  { %690 = vmatpush.bf16.msrb.mxu0 %v1204_v0 }
  0x4a   :  { %704 = vmatpush.bf16.msrb.mxu1 %v1212_v1 }
  0x4b   :  { %718 = vmatpush.bf16.msrb.mxu2 %v1220_v2 }
  0x4c   :  { %732 = vmatpush.bf16.msrb.mxu3 %v1228_v3  ;;  %v1251_v3 = vld [vmem:[#allocation9] ss:$0 sm:$0xff] }
  0x4d   :  { %691 = vmatpush.bf16.msrb.mxu0 %v1203_v4 }
  0x4e   :  { %705 = vmatpush.bf16.msrb.mxu1 %v1211_v5 }
  0x4f   :  { %719 = vmatpush.bf16.msrb.mxu2 %v1219_v6 }
  0x50   :  { %733 = vmatpush.bf16.msrb.mxu3 %v1227_v7 }
  0x51   :  { %692 = vmatpush.bf16.msrb.mxu0 %v1202_v8 }
  0x52   :  { %706 = vmatpush.bf16.msrb.mxu1 %v1210_v9 }
  0x53   :  { %720 = vmatpush.bf16.msrb.mxu2 %v1218_v10 }
  0x54   :  { %734 = vmatpush.bf16.msrb.mxu3 %v1226_v11  ;;  %693 = vmatmul.bf16.vlgmr.msrb.gmra.mxu0 %v113_v20 }
  0x55   :  { %707 = vmatmul.bf16.vlgmr.msrb.gmra.mxu1 %v114_v21 }
  0x56   :  { %721 = vmatmul.bf16.vlgmr.msrb.gmra.mxu2 %v115_v22  ;;  %848 = vmatpush.bf16.msra.mxu1 %v1241_v28 }
  0x57   :  { %735 = vmatmul.bf16.vlgmr.msrb.gmra.mxu3 %v116_v23 }
  0x5a   :  { %849 = vmatpush.bf16.msra.mxu1 %v1240_v30 }
  0x5e   :  { %850 = vmatpush.bf16.msra.mxu1 %v1239_v32 }
  0x62   :  { %851 = vmatpush.bf16.msra.mxu1 %v1238_v38 }
  0x66   :  { %852 = vmatpush.bf16.msra.mxu1 %v1237_v42 }
  0x6a   :  { %853 = vmatpush.bf16.msra.mxu1 %v1236_v48 }
  0x6e   :  { %854 = vmatpush.bf16.msra.mxu1 %v1235_v52 }
  0x72   :  { %855 = vmatpush.bf16.msra.mxu1 %v1234_v62 }
  0xb1   :  { %v638_v24 = vpop.f32.mrf.mxu0 }
  0xb2   :  { %v652_v25 = vpop.f32.mrf.mxu1 }
  0xb3   :  { %v653_v35 = vadd.f32 %v652_v25, %v638_v24 }
  0xb9   :  { %v666_v26 = vpop.f32.mrf.mxu2  ;;  %v640_v29 = vpop.f32.mrf.mxu0 }
  0xba   :  { %v680_v27 = vpop.f32.mrf.mxu3  ;;  %v654_v31 = vpop.f32.mrf.mxu1  ;;  %v667_v40 = vadd.f32 %v666_v26, %v653_v35 }
  0xbb   :  { %v655_v36 = vadd.f32 %v654_v31, %v640_v29 }
  0xbc   :  { %v681_v45 = vadd.f32 %v680_v27, %v667_v40 }
  0xc1   :  { %v668_v33 = vpop.f32.mrf.mxu2 }
  0xc2   :  { %v682_v34 = vpop.f32.mrf.mxu3  ;;  %v669_v41 = vadd.f32 %v668_v33, %v655_v36 }
  0xc4   :  { %v683_v46 = vadd.f32 %v682_v34, %v669_v41 }
  0xd1   :  { %v694_v37 = vpop.f32.mrf.mxu0 }
  0xd2   :  { %v708_v39 = vpop.f32.mrf.mxu1  ;;  %v695_v49 = vadd.f32 %v694_v37, %v681_v45 }
  0xd4   :  { %v709_v53 = vadd.f32 %v708_v39, %v695_v49 }
  0xd9   :  { %v722_v43 = vpop.f32.mrf.mxu2  ;;  %v696_v47 = vpop.f32.mrf.mxu0 }
  0xda   :  { %v736_v44 = vpop.f32.mrf.mxu3  ;;  %v697_v50 = vadd.f32 %v696_v47, %v683_v46  ;;  %v710_v51 = vpop.f32.mrf.mxu1  ;;  %v723_v56 = vadd.f32 %v722_v43, %v709_v53 }
  0xdc   :  { %v711_v54 = vadd.f32 %v710_v51, %v697_v50  ;;  %v737_v60 = vadd.f32 %v736_v44, %v723_v56 }
  0xe1   :  { %v724_v55 = vpop.f32.mrf.mxu2 }
  0xe2   :  { %v725_v57 = vadd.f32 %v724_v55, %v711_v54  ;;  %v738_v58 = vpop.f32.mrf.mxu3 }
  0xe4   :  { %v739_v59 = vadd.f32 %v738_v58, %v725_v57 }
  0xe6   :  { %773 = vmatpush.msra.mxu0 %v739_v59 }
  0xe8   :  { %774 = vmatpush.msra.mxu0 %v737_v60 }
  0xe9   :  { %1137 = vmatmul.msk.f32.vlgmr.msra.gmra.mxu0 %vm755_vm0, %v748_v61 }
 0x166   :  { %v776_v0 = vpop.f32.mrf.mxu0 }
 0x167   :  { %v777_v1 = vadd.f32 %v1250_v63, %v776_v0 }
 0x169   :  { %v779_v2 = vpack.c.bf16 %v777_v1, %v777_v1 }
 0x16b   :  { %856 = vmatmul.bf16.vlgmr.msra.gmra.mxu1 %v779_v2 }
 0x1e8   :  { %v857_v4 = vpop.f32.mrf.mxu1 }
 0x1e9   :  { %v858_v5 = vadd.f32 %v1251_v3, %v857_v4 }
 0x1eb   :  { %861 = vst [vmem:[#allocation11] sm:$0x3] %v858_v5 }
 0x1ec   :  { %872 = dma.vmem_to_hbm [thread:$0]  %s868_s21, 32, %s870_s5, [#allocation5]  }
 0x1f0   :  { %v859_v6 = vpop.f32.mrf.mxu1 }
 0x1f1   :  { %1378 = dma.done.wait [#allocation5], 32  }
 0x1f2   :  { %1379 = vsyncadd [#allocation5], 4294967264 }
 0x1f3   :  { %877 = vsyncpa [#allocation4], 1 }
 0x1f4   :  { %878 = vsyncpa [#allocation7], 1 }
 0x1f5   :  { %879 = vsyncpa [#allocation10], 1 }
 0x1f6   :  { %880 = vsyncpa [#allocation5], 1 }

// kernel: tpu_custom_call.1
= control target key start
LH: loop header
LB: loop body
LE: loop exit
PB: predicated region body
PF: predicated region fallthrough
CT: control target
= control target key end

     0   :  { %11 = vsyncpa [#allocation4], 0  ;;  %s1444_s0 = inlined_call_operand.hbm [shape: f32[16,1024], index: 0, kind: input, shape index: {}]   ;;  %s1445_s1 = inlined_call_operand.hbm [shape: bf16[1024,128], index: 1, kind: input, shape index: {}]   ;;  %s1446_s2 = inlined_call_operand.vmem [shape: f32[1,128], index: 2, kind: input, shape index: {}]   ;;  %s1447_s3 = inlined_call_operand.hbm [shape: bf16[128,128], index: 3, kind: input, shape index: {}]   ;;  %s1448_s4 = inlined_call_operand.hbm [shape: f32[1,128], index: 4, kind: input, shape index: {}]   ;;  %s1449_s5 = inlined_call_operand.vmem [shape: f32[2,16], index: 5, kind: input, shape index: {}]   ;;  %s1450_s6 = inlined_call_operand.hbm [shape: f32[2,128], index: 6, kind: output, shape index: {}]  }
   0x1   :  { %12 = vsyncpa [#allocation7], 0 }
   0x2   :  { %13 = vsyncpa [#allocation10], 0  ;;  %s32_s23 = sshll.u32 %s1445_s1, 4  ;;  %s33_s23 = int_to_ptr.hbm [resolvable:$true] %s32_s23 }
   0x3   :  { %14 = vsyncpa [#allocation5], 0  ;;  %s1380_s24 = smov [#allocation6]   ;;  %s19_s28 = sshll.u32 %s1444_s0, 4  ;;  %s20_s28 = int_to_ptr.hbm [resolvable:$true] %s19_s28 }
   0x4   :  { %s34_s25 = sshll.u32 %s1380_s24, 4  ;;  %s1381_s29 = smov 64   ;;  %s35_s25 = int_to_ptr.vmem [resolvable:$true] %s34_s25 }
   0x5   :  { %s1382_s30 = smov 4   ;;  %s1383_s7 = smov [#allocation3]  }
   0x6   :  { %40 = dma.hbm_to_vmem [thread:$0]  %s33_s23, 8192, %s35_s25, [#allocation7], %s1381_s29, %s1381_s29, %s1382_s30  }
   0x7   :  { %s21_s8 = sshll.u32 %s1383_s7, 4  ;;  %s47_s1 = sshll.u32 %s1447_s3, 4  ;;  %s22_s8 = int_to_ptr.vmem [resolvable:$true] %s21_s8  ;;  %s48_s1 = int_to_ptr.hbm [resolvable:$true] %s47_s1 }
   0x8   :  { %s1384_s11 = smov 1024   ;;  %s1385_s12 = smov [#allocation8]  }
   0x9   :  { %27 = dma.hbm_to_vmem [thread:$0]  %s20_s28, 2048, %s22_s8, [#allocation4], %s1384_s11, %s1384_s11, %s1381_s29  }
   0xa   :  { %s49_s13 = sshll.u32 %s1385_s12, 4  ;;  %s61_s0 = sshll.u32 %s1448_s4, 4  ;;  %s50_s13 = int_to_ptr.vmem [resolvable:$true] %s49_s13  ;;  %s62_s0 = int_to_ptr.hbm [resolvable:$true] %s61_s0 }
   0xb   :  { %55 = dma.hbm_to_vmem [thread:$0]  %s48_s1, 1024, %s50_s13, [#allocation7], %s1381_s29, %s1381_s29, %s1382_s30  }
   0xc   :  { %s1386_s16 = smov [#allocation9]  }
   0xd   :  { %s63_s17 = sshll.u32 %s1386_s16, 4  ;;  %s64_s17 = int_to_ptr.vmem [resolvable:$true] %s63_s17 }
   0xe   :  { %66 = dma.hbm_to_vmem [thread:$0]  %s62_s0, 16, %s64_s17, [#allocation10]  }
   0xf   :  { %1372 = dma.done.wait [#allocation4], 2048  }
  0x10   :  { %1373 = vsyncadd [#allocation4], 4294965248 }
  0x11   :  { %1374 = dma.done.wait [#allocation7], 9216  }
  0x12   :  { %1375 = vsyncadd [#allocation7], 4294958080 }
  0x13   :  { %1376 = dma.done.wait [#allocation10], 16  }
  0x14   :  { %1377 = vsyncadd [#allocation10], 4294967280  ;;  %v1177_v0 = vld [vmem:[#allocation6 + $0x38] sm:$0xff]  ;;  %v1176_v4 = vld [vmem:[#allocation6 + $0x30] sm:$0xff]  ;;  %vm755_vm0 = vcmask 130048   ;;  %s1387_s20 = smov [#allocation11]  }
  0x15   :  { %v1185_v1 = vld [vmem:[#allocation6 + $0x78] sm:$0xff]  ;;  %629 = vmatpush.bf16.msra.mxu0 %v1177_v0  ;;  %v1184_v5 = vld [vmem:[#allocation6 + $0x70] sm:$0xff]  ;;  %v1175_v8 = vld [vmem:[#allocation6 + $0x28] sm:$0xff]  ;;  %s867_s21 = sshll.u32 %s1387_s20, 4  ;;  %s868_s21 = int_to_ptr.vmem [resolvable:$true] %s867_s21 }
  0x16   :  { %v1193_v2 = vld [vmem:[#allocation6 + $0xb8] sm:$0xff]  ;;  %643 = vmatpush.bf16.msra.mxu1 %v1185_v1  ;;  %v1192_v6 = vld [vmem:[#allocation6 + $0xb0] sm:$0xff]  ;;  %v1183_v9 = vld [vmem:[#allocation6 + $0x68] sm:$0xff] }
  0x17   :  { %v1201_v3 = vld [vmem:[#allocation6 + $0xf8] sm:$0xff]  ;;  %657 = vmatpush.bf16.msra.mxu2 %v1193_v2  ;;  %v1200_v7 = vld [vmem:[#allocation6 + $0xf0] sm:$0xff]  ;;  %v1191_v10 = vld [vmem:[#allocation6 + $0xa8] sm:$0xff] }
  0x18   :  { %671 = vmatpush.bf16.msra.mxu3 %v1201_v3  ;;  %v1199_v11 = vld [vmem:[#allocation6 + $0xe8] sm:$0xff]  ;;  %v1174_v12 = vld [vmem:[#allocation6 + $0x20] sm:$0xff]  ;;  %v1173_v16 = vld [vmem:[#allocation6 + $0x18] sm:$0xff] }
  0x19   :  { %630 = vmatpush.bf16.msra.mxu0 %v1176_v4  ;;  %v1182_v13 = vld [vmem:[#allocation6 + $0x60] sm:$0xff]  ;;  %v1181_v17 = vld [vmem:[#allocation6 + $0x58] sm:$0xff]  ;;  %v1172_v20 = vld [vmem:[#allocation6 + $0x10] sm:$0xff] }
  0x1a   :  { %644 = vmatpush.bf16.msra.mxu1 %v1184_v5  ;;  %v1190_v14 = vld [vmem:[#allocation6 + $0xa0] sm:$0xff]  ;;  %v1189_v18 = vld [vmem:[#allocation6 + $0x98] sm:$0xff]  ;;  %v1180_v21 = vld [vmem:[#allocation6 + $0x50] sm:$0xff] }
  0x1b   :  { %658 = vmatpush.bf16.msra.mxu2 %v1192_v6  ;;  %v1198_v15 = vld [vmem:[#allocation6 + $0xe0] sm:$0xff]  ;;  %v1197_v19 = vld [vmem:[#allocation6 + $0xd8] sm:$0xff]  ;;  %v1188_v22 = vld [vmem:[#allocation6 + $0x90] sm:$0xff] }
  0x1c   :  { %672 = vmatpush.bf16.msra.mxu3 %v1200_v7  ;;  %v1196_v23 = vld [vmem:[#allocation6 + $0xd0] sm:$0xff]  ;;  %v1171_v24 = vld [vmem:[#allocation6 + $0x8] sm:$0xff]  ;;  %v1170_v28 = vld [vmem:[#allocation6] sm:$0xff] }
  0x1d   :  { %631 = vmatpush.bf16.msra.mxu0 %v1175_v8  ;;  %v1179_v25 = vld [vmem:[#allocation6 + $0x48] sm:$0xff]  ;;  %v1178_v29 = vld [vmem:[#allocation6 + $0x40] sm:$0xff]  ;;  %v1209_v32 = vld [vmem:[#allocation6 + $0x138] sm:$0xff] }
  0x1e   :  { %645 = vmatpush.bf16.msra.mxu1 %v1183_v9  ;;  %v1187_v26 = vld [vmem:[#allocation6 + $0x88] sm:$0xff]  ;;  %v1186_v30 = vld [vmem:[#allocation6 + $0x80] sm:$0xff]  ;;  %v1217_v33 = vld [vmem:[#allocation6 + $0x178] sm:$0xff] }
  0x1f   :  { %659 = vmatpush.bf16.msra.mxu2 %v1191_v10  ;;  %v1195_v27 = vld [vmem:[#allocation6 + $0xc8] sm:$0xff]  ;;  %v1194_v31 = vld [vmem:[#allocation6 + $0xc0] sm:$0xff]  ;;  %v95_v34 = vld [vmem:[#allocation3 + $0x10] sm:$0xff] }
  0x20   :  { %673 = vmatpush.bf16.msra.mxu3 %v1199_v11  ;;  %v103_v35 = vld [vmem:[#allocation3 + $0x50] sm:$0xff]  ;;  %v96_v36 = vld [vmem:[#allocation3 + $0x18] sm:$0xff]  ;;  %v93_v38 = vld [vmem:[#allocation3] sm:$0xff] }
  0x21   :  { %632 = vmatpush.bf16.msra.mxu0 %v1174_v12  ;;  %v104_v37 = vld [vmem:[#allocation3 + $0x58] sm:$0xff]  ;;  %v101_v39 = vld [vmem:[#allocation3 + $0x40] sm:$0xff]  ;;  %v94_v40 = vld [vmem:[#allocation3 + $0x8] sm:$0xff]  ;;  %v111_v44 = vpack.c.bf16 %v103_v35, %v95_v34 }
  0x22   :  { %646 = vmatpush.bf16.msra.mxu1 %v1182_v13  ;;  %v102_v41 = vld [vmem:[#allocation3 + $0x48] sm:$0xff]  ;;  %v1225_v42 = vld [vmem:[#allocation6 + $0x1b8] sm:$0xff]  ;;  %v112_v45 = vpack.c.bf16 %v104_v37, %v96_v36  ;;  %v109_v46 = vpack.c.bf16 %v101_v39, %v93_v38  ;;  %v1208_v48 = vld [vmem:[#allocation6 + $0x130] sm:$0xff] }
  0x23   :  { %660 = vmatpush.bf16.msra.mxu2 %v1190_v14  ;;  %v1233_v43 = vld [vmem:[#allocation6 + $0x1f8] sm:$0xff]  ;;  %v110_v47 = vpack.c.bf16 %v102_v41, %v94_v40  ;;  %v1216_v49 = vld [vmem:[#allocation6 + $0x170] sm:$0xff]  ;;  %v1207_v52 = vld [vmem:[#allocation6 + $0x128] sm:$0xff] }
  0x24   :  { %674 = vmatpush.bf16.msra.mxu3 %v1198_v15  ;;  %v1224_v50 = vld [vmem:[#allocation6 + $0x1b0] sm:$0xff]  ;;  %v1215_v53 = vld [vmem:[#allocation6 + $0x168] sm:$0xff]  ;;  %v1206_v56 = vld [vmem:[#allocation6 + $0x120] sm:$0xff] }
  0x25   :  { %633 = vmatpush.bf16.msra.mxu0 %v1173_v16  ;;  %v1232_v51 = vld [vmem:[#allocation6 + $0x1f0] sm:$0xff]  ;;  %v1223_v54 = vld [vmem:[#allocation6 + $0x1a8] sm:$0xff]  ;;  %v1214_v57 = vld [vmem:[#allocation6 + $0x160] sm:$0xff] }
  0x26   :  { %647 = vmatpush.bf16.msra.mxu1 %v1181_v17  ;;  %v1231_v55 = vld [vmem:[#allocation6 + $0x1e8] sm:$0xff]  ;;  %v1222_v58 = vld [vmem:[#allocation6 + $0x1a0] sm:$0xff]  ;;  %v1205_v60 = vld [vmem:[#allocation6 + $0x118] sm:$0xff] }
  0x27   :  { %661 = vmatpush.bf16.msra.mxu2 %v1189_v18  ;;  %v1230_v59 = vld [vmem:[#allocation6 + $0x1e0] sm:$0xff]  ;;  %v1213_v61 = vld [vmem:[#allocation6 + $0x158] sm:$0xff]  ;;  %v1204_v0 = vld [vmem:[#allocation6 + $0x110] sm:$0xff] }
  0x28   :  { %675 = vmatpush.bf16.msra.mxu3 %v1197_v19  ;;  %v1221_v62 = vld [vmem:[#allocation6 + $0x198] sm:$0xff]  ;;  %v1212_v1 = vld [vmem:[#allocation6 + $0x150] sm:$0xff]  ;;  %v1203_v4 = vld [vmem:[#allocation6 + $0x108] sm:$0xff] }
  0x29   :  { %634 = vmatpush.bf16.msra.mxu0 %v1172_v20  ;;  %v1229_v63 = vld [vmem:[#allocation6 + $0x1d8] sm:$0xff]  ;;  %v1220_v2 = vld [vmem:[#allocation6 + $0x190] sm:$0xff]  ;;  %v1211_v5 = vld [vmem:[#allocation6 + $0x148] sm:$0xff] }
  0x2a   :  { %648 = vmatpush.bf16.msra.mxu1 %v1180_v21  ;;  %v1228_v3 = vld [vmem:[#allocation6 + $0x1d0] sm:$0xff]  ;;  %v1219_v6 = vld [vmem:[#allocation6 + $0x188] sm:$0xff]  ;;  %v1202_v8 = vld [vmem:[#allocation6 + $0x100] sm:$0xff] }
  0x2b   :  { %662 = vmatpush.bf16.msra.mxu2 %v1188_v22  ;;  %v1227_v7 = vld [vmem:[#allocation6 + $0x1c8] sm:$0xff]  ;;  %v1210_v9 = vld [vmem:[#allocation6 + $0x140] sm:$0xff]  ;;  %v99_v16 = vld [vmem:[#allocation3 + $0x30] sm:$0xff] }
  0x2c   :  { %676 = vmatpush.bf16.msra.mxu3 %v1196_v23  ;;  %v1218_v10 = vld [vmem:[#allocation6 + $0x180] sm:$0xff]  ;;  %v98_v14 = vld [vmem:[#allocation3 + $0x28] sm:$0xff]  ;;  %v107_v17 = vld [vmem:[#allocation3 + $0x70] sm:$0xff] }
  0x2d   :  { %635 = vmatpush.bf16.msra.mxu0 %v1171_v24  ;;  %v1226_v11 = vld [vmem:[#allocation6 + $0x1c0] sm:$0xff]  ;;  %v106_v15 = vld [vmem:[#allocation3 + $0x68] sm:$0xff]  ;;  %v100_v18 = vld [vmem:[#allocation3 + $0x38] sm:$0xff]  ;;  %v115_v22 = vpack.c.bf16 %v107_v17, %v99_v16 }
  0x2e   :  { %649 = vmatpush.bf16.msra.mxu1 %v1179_v25  ;;  %v97_v12 = vld [vmem:[#allocation3 + $0x20] sm:$0xff]  ;;  %v108_v19 = vld [vmem:[#allocation3 + $0x78] sm:$0xff]  ;;  %v114_v21 = vpack.c.bf16 %v106_v15, %v98_v14 }
  0x2f   :  { %663 = vmatpush.bf16.msra.mxu2 %v1187_v26  ;;  %v105_v13 = vld [vmem:[#allocation3 + $0x60] sm:$0xff]  ;;  %v116_v23 = vpack.c.bf16 %v108_v19, %v100_v18 }
  0x30   :  { %677 = vmatpush.bf16.msra.mxu3 %v1195_v27  ;;  %v113_v20 = vpack.c.bf16 %v105_v13, %v97_v12  ;;  %v1238_v38 = vld [vmem:[#allocation8 + $0x20] sm:$0xff] }
  0x31   :  { %636 = vmatpush.bf16.msra.mxu0 %v1170_v28  ;;  %v1241_v28 = vld [vmem:[#allocation8 + $0x38] sm:$0xff] }
  0x32   :  { %650 = vmatpush.bf16.msra.mxu1 %v1178_v29 }
  0x33   :  { %664 = vmatpush.bf16.msra.mxu2 %v1186_v30  ;;  %v1240_v30 = vld [vmem:[#allocation8 + $0x30] sm:$0xff] }
  0x34   :  { %678 = vmatpush.bf16.msra.mxu3 %v1194_v31  ;;  %637 = vmatmul.bf16.vlgmr.msra.gmra.mxu0 %v109_v46 }
  0x35   :  { %685 = vmatpush.bf16.msrb.mxu0 %v1209_v32  ;;  %651 = vmatmul.bf16.vlgmr.msra.gmra.mxu1 %v110_v47  ;;  %v1239_v32 = vld [vmem:[#allocation8 + $0x28] sm:$0xff] }
  0x36   :  { %699 = vmatpush.bf16.msrb.mxu1 %v1217_v33  ;;  %665 = vmatmul.bf16.vlgmr.msra.gmra.mxu2 %v111_v44 }
  0x37   :  { %713 = vmatpush.bf16.msrb.mxu2 %v1225_v42  ;;  %679 = vmatmul.bf16.vlgmr.msra.gmra.mxu3 %v112_v45  ;;  %v1237_v42 = vld [vmem:[#allocation8 + $0x18] sm:$0xff] }
  0x38   :  { %727 = vmatpush.bf16.msrb.mxu3 %v1233_v43 }
  0x39   :  { %686 = vmatpush.bf16.msrb.mxu0 %v1208_v48  ;;  %v1236_v48 = vld [vmem:[#allocation8 + $0x10] sm:$0xff] }
  0x3a   :  { %700 = vmatpush.bf16.msrb.mxu1 %v1216_v49 }
  0x3b   :  { %714 = vmatpush.bf16.msrb.mxu2 %v1224_v50 }
  0x3c   :  { %728 = vmatpush.bf16.msrb.mxu3 %v1232_v51 }
  0x3d   :  { %687 = vmatpush.bf16.msrb.mxu0 %v1207_v52  ;;  %v1235_v52 = vld [vmem:[#allocation8 + $0x8] sm:$0xff] }
  0x3e   :  { %701 = vmatpush.bf16.msrb.mxu1 %v1215_v53 }
  0x3f   :  { %715 = vmatpush.bf16.msrb.mxu2 %v1223_v54 }
  0x40   :  { %729 = vmatpush.bf16.msrb.mxu3 %v1231_v55 }
  0x41   :  { %688 = vmatpush.bf16.msrb.mxu0 %v1206_v56 }
  0x42   :  { %702 = vmatpush.bf16.msrb.mxu1 %v1214_v57 }
  0x43   :  { %716 = vmatpush.bf16.msrb.mxu2 %v1222_v58 }
  0x44   :  { %730 = vmatpush.bf16.msrb.mxu3 %v1230_v59 }
  0x45   :  { %689 = vmatpush.bf16.msrb.mxu0 %v1205_v60 }
  0x46   :  { %703 = vmatpush.bf16.msrb.mxu1 %v1213_v61  ;;  %v748_v61 = vld [vmem:[%s1449_s5] sm:$0x3]  ;;  %s869_s5 = sshll.u32 %s1450_s6, 4  ;;  %s870_s5 = int_to_ptr.hbm [resolvable:$true] %s869_s5 }
  0x47   :  { %717 = vmatpush.bf16.msrb.mxu2 %v1221_v62  ;;  %v1234_v62 = vld [vmem:[#allocation8] sm:$0xff] }
  0x48   :  { %731 = vmatpush.bf16.msrb.mxu3 %v1229_v63  ;;  %v1250_v63 = vld [vmem:[%s1446_s2] ss:$0 sm:$0xff] }
  0x49   :  { %690 = vmatpush.bf16.msrb.mxu0 %v1204_v0 }
  0x4a   :  { %704 = vmatpush.bf16.msrb.mxu1 %v1212_v1 }
  0x4b   :  { %718 = vmatpush.bf16.msrb.mxu2 %v1220_v2 }
  0x4c   :  { %732 = vmatpush.bf16.msrb.mxu3 %v1228_v3  ;;  %v1251_v3 = vld [vmem:[#allocation9] ss:$0 sm:$0xff] }
  0x4d   :  { %691 = vmatpush.bf16.msrb.mxu0 %v1203_v4 }
  0x4e   :  { %705 = vmatpush.bf16.msrb.mxu1 %v1211_v5 }
  0x4f   :  { %719 = vmatpush.bf16.msrb.mxu2 %v1219_v6 }
  0x50   :  { %733 = vmatpush.bf16.msrb.mxu3 %v1227_v7 }
  0x51   :  { %692 = vmatpush.bf16.msrb.mxu0 %v1202_v8 }
  0x52   :  { %706 = vmatpush.bf16.msrb.mxu1 %v1210_v9 }
  0x53   :  { %720 = vmatpush.bf16.msrb.mxu2 %v1218_v10 }
  0x54   :  { %734 = vmatpush.bf16.msrb.mxu3 %v1226_v11  ;;  %693 = vmatmul.bf16.vlgmr.msrb.gmra.mxu0 %v113_v20 }
  0x55   :  { %707 = vmatmul.bf16.vlgmr.msrb.gmra.mxu1 %v114_v21 }
  0x56   :  { %721 = vmatmul.bf16.vlgmr.msrb.gmra.mxu2 %v115_v22  ;;  %848 = vmatpush.bf16.msra.mxu1 %v1241_v28 }
  0x57   :  { %735 = vmatmul.bf16.vlgmr.msrb.gmra.mxu3 %v116_v23 }
  0x5a   :  { %849 = vmatpush.bf16.msra.mxu1 %v1240_v30 }
  0x5e   :  { %850 = vmatpush.bf16.msra.mxu1 %v1239_v32 }
  0x62   :  { %851 = vmatpush.bf16.msra.mxu1 %v1238_v38 }
  0x66   :  { %852 = vmatpush.bf16.msra.mxu1 %v1237_v42 }
  0x6a   :  { %853 = vmatpush.bf16.msra.mxu1 %v1236_v48 }
  0x6e   :  { %854 = vmatpush.bf16.msra.mxu1 %v1235_v52 }
  0x72   :  { %855 = vmatpush.bf16.msra.mxu1 %v1234_v62 }
  0xb1   :  { %v638_v24 = vpop.f32.mrf.mxu0 }
  0xb2   :  { %v652_v25 = vpop.f32.mrf.mxu1 }
  0xb3   :  { %v653_v35 = vadd.f32 %v652_v25, %v638_v24 }
  0xb9   :  { %v666_v26 = vpop.f32.mrf.mxu2  ;;  %v640_v29 = vpop.f32.mrf.mxu0 }
  0xba   :  { %v680_v27 = vpop.f32.mrf.mxu3  ;;  %v654_v31 = vpop.f32.mrf.mxu1  ;;  %v667_v40 = vadd.f32 %v666_v26, %v653_v35 }
  0xbb   :  { %v655_v36 = vadd.f32 %v654_v31, %v640_v29 }
  0xbc   :  { %v681_v45 = vadd.f32 %v680_v27, %v667_v40 }
  0xc1   :  { %v668_v33 = vpop.f32.mrf.mxu2 }
  0xc2   :  { %v682_v34 = vpop.f32.mrf.mxu3  ;;  %v669_v41 = vadd.f32 %v668_v33, %v655_v36 }
  0xc4   :  { %v683_v46 = vadd.f32 %v682_v34, %v669_v41 }
  0xd1   :  { %v694_v37 = vpop.f32.mrf.mxu0 }
  0xd2   :  { %v708_v39 = vpop.f32.mrf.mxu1  ;;  %v695_v49 = vadd.f32 %v694_v37, %v681_v45 }
  0xd4   :  { %v709_v53 = vadd.f32 %v708_v39, %v695_v49 }
  0xd9   :  { %v722_v43 = vpop.f32.mrf.mxu2  ;;  %v696_v47 = vpop.f32.mrf.mxu0 }
  0xda   :  { %v736_v44 = vpop.f32.mrf.mxu3  ;;  %v697_v50 = vadd.f32 %v696_v47, %v683_v46  ;;  %v710_v51 = vpop.f32.mrf.mxu1  ;;  %v723_v56 = vadd.f32 %v722_v43, %v709_v53 }
  0xdc   :  { %v711_v54 = vadd.f32 %v710_v51, %v697_v50  ;;  %v737_v60 = vadd.f32 %v736_v44, %v723_v56 }
  0xe1   :  { %v724_v55 = vpop.f32.mrf.mxu2 }
  0xe2   :  { %v725_v57 = vadd.f32 %v724_v55, %v711_v54  ;;  %v738_v58 = vpop.f32.mrf.mxu3 }
  0xe4   :  { %v739_v59 = vadd.f32 %v738_v58, %v725_v57 }
  0xe6   :  { %773 = vmatpush.msra.mxu0 %v739_v59 }
  0xe8   :  { %774 = vmatpush.msra.mxu0 %v737_v60 }
  0xe9   :  { %1137 = vmatmul.msk.f32.vlgmr.msra.gmra.mxu0 %vm755_vm0, %v748_v61 }
 0x166   :  { %v776_v0 = vpop.f32.mrf.mxu0 }
 0x167   :  { %v777_v1 = vadd.f32 %v1250_v63, %v776_v0 }
 0x169   :  { %v779_v2 = vpack.c.bf16 %v777_v1, %v777_v1 }
 0x16b   :  { %856 = vmatmul.bf16.vlgmr.msra.gmra.mxu1 %v779_v2 }
 0x1e8   :  { %v857_v4 = vpop.f32.mrf.mxu1 }
 0x1e9   :  { %v858_v5 = vadd.f32 %v1251_v3, %v857_v4 }
 0x1eb   :  { %861 = vst [vmem:[#allocation11] sm:$0x3] %v858_v5 }
 0x1ec   :  { %872 = dma.vmem_to_hbm [thread:$0]  %s868_s21, 32, %s870_s5, [#allocation5]  }
 0x1f0   :  { %v859_v6 = vpop.f32.mrf.mxu1 }
 0x1f1   :  { %1378 = dma.done.wait [#allocation5], 32  }
 0x1f2   :  { %1379 = vsyncadd [#allocation5], 4294967264 }
 0x1f3   :  { %877 = vsyncpa [#allocation4], 1 }
 0x1f4   :  { %878 = vsyncpa [#allocation7], 1 }
 0x1f5   :  { %879 = vsyncpa [#allocation10], 1 }
 0x1f6   :  { %880 = vsyncpa [#allocation5], 1 }

</bundles_post_ra>
